<compile_context>
chip_gen: v6e
topology: v6e:2x2x1
jax: 0.10.0
libtpu: 0.0.40
codegen_flags: <defaults>
</compile_context>

<pallas_src>
import functools

import jax
import jax.numpy as jnp
from jax.experimental import pallas as pl
from jax.experimental.pallas import tpu as pltpu


def roberta_output_kernel(x_ref, wt_ref, b_ref, res_ref, gamma_ref, beta_ref,
                          o_ref, *, eps):
    # x_ref:    (TM, D_in)    tile of flattened hidden_states (native dtype)
    # wt_ref:   (D_in, D_out) pre-transposed dense weight (native dtype, resident)
    # b_ref:    (1, D_out)    dense bias
    # res_ref:  (TM, D_out)   tile of residual (input_tensor)
    # gamma/beta: (1, D_out)  LayerNorm affine params
    # o_ref:    (TM, D_out)
    #
    # Matmul in the operands' native dtype (bf16 x bf16 -> f32 runs at full MXU
    # rate); accumulate in f32 via preferred_element_type.
    y = jnp.dot(x_ref[...], wt_ref[...], preferred_element_type=jnp.float32)

    # f32 epilogue: bias + residual + LayerNorm over the feature (lane) axis.
    y = y + b_ref[...].astype(jnp.float32)
    y = y + res_ref[...].astype(jnp.float32)

    mean = jnp.mean(y, axis=-1, keepdims=True)
    centered = y - mean
    var = jnp.mean(centered * centered, axis=-1, keepdims=True)
    inv = jax.lax.rsqrt(var + eps)
    out = (centered * inv) * gamma_ref[...].astype(jnp.float32) \
          + beta_ref[...].astype(jnp.float32)

    o_ref[...] = out.astype(o_ref.dtype)


def _round_up(x, m):
    return (x + m - 1) // m * m


def tt_roberta_output(hidden_states, input_tensor, weight, bias, gamma, beta,
                      *, eps=1e-12, tile_m=256):
    """hidden_states: [B, S, D_in], input_tensor: [B, S, D_out]
       weight: [D_out, D_in] (PyTorch Linear), bias/gamma/beta: [D_out]"""
    B, S, D_in = hidden_states.shape
    D_out = weight.shape[0]
    assert input_tensor.shape == (B, S, D_out)

    M = B * S
    dtype = hidden_states.dtype
    # Sublane packing: 8 rows per vreg for 32-bit, 16 for bf16, 32 for 8-bit.
    sublane = max(8, 32 // jnp.dtype(dtype).itemsize)
    tile_m_eff = max(sublane, _round_up(min(tile_m, M), sublane))
    M_pad = _round_up(M, tile_m_eff)

    x2d = hidden_states.reshape(M, D_in)
    res2d = input_tensor.reshape(M, D_out)
    if M_pad != M:
        # Zero-pad rows; padded rows produce finite LayerNorm output (var=0,
        # eps>0) and are sliced off below.
        x2d = jnp.pad(x2d, ((0, M_pad - M), (0, 0)))
        res2d = jnp.pad(res2d, ((0, M_pad - M), (0, 0)))

    # Transpose once at trace time (free in XLA) -> MXU-native [K, N] layout.
    wt = jnp.transpose(weight)          # [D_in, D_out]
    b2d = bias.reshape(1, D_out)
    g2d = gamma.reshape(1, D_out)
    be2d = beta.reshape(1, D_out)

    kernel = functools.partial(roberta_output_kernel, eps=eps)

    grid = (M_pad // tile_m_eff,)

    out2d = pl.pallas_call(
        kernel,
        out_shape=jax.ShapeDtypeStruct((M_pad, D_out), dtype),
        grid_spec=pltpu.PrefetchScalarGridSpec(
            num_scalar_prefetch=0,
            grid=grid,
            in_specs=[
                pl.BlockSpec((tile_m_eff, D_in), lambda i: (i, 0)),   # x tile
                pl.BlockSpec((D_in, D_out), lambda i: (0, 0)),        # weight^T (resident)
                pl.BlockSpec((1, D_out), lambda i: (0, 0)),           # bias
                pl.BlockSpec((tile_m_eff, D_out), lambda i: (i, 0)),  # residual tile
                pl.BlockSpec((1, D_out), lambda i: (0, 0)),           # gamma
                pl.BlockSpec((1, D_out), lambda i: (0, 0)),           # beta
            ],
            out_specs=pl.BlockSpec((tile_m_eff, D_out), lambda i: (i, 0)),
        ),
        compiler_params=pltpu.CompilerParams(
            dimension_semantics=("parallel",),
            # Allow resident weight + large row tiles; 56 MiB is within v7x's
            # 64 MiB physical VMEM and well within v5e/v6e's 128 MiB.
            vmem_limit_bytes=56 * 1024 * 1024,
        ),
    )(x2d, wt, b2d, res2d, g2d, be2d)

    return out2d[:M].reshape(B, S, D_out)


def _reference(hidden_states, input_tensor, weight, bias, gamma, beta, eps=1e-12):
    y = jnp.einsum("bsi,oi->bso", hidden_states.astype(jnp.float32),
                   weight.astype(jnp.float32)) + bias.astype(jnp.float32)
    y = y + input_tensor.astype(jnp.float32)
    mean = jnp.mean(y, axis=-1, keepdims=True)
    var = jnp.mean((y - mean) ** 2, axis=-1, keepdims=True)
    yn = (y - mean) * jax.lax.rsqrt(var + eps)
    return yn * gamma.astype(jnp.float32) + beta.astype(jnp.float32)


if __name__ == "__main__":
    eps = 1e-12
    key = jax.random.PRNGKey(0)
    k_x, k_res, k_w, k_b, k_g, k_be = jax.random.split(key, 6)

    # Small RoBERTa-like config: intermediate_size=256, hidden_size=128
    B, S = 2, 8
    D_in, D_out = 256, 128

    hidden_states = jax.random.normal(k_x, (B, S, D_in), dtype=jnp.float32)
    input_tensor = jax.random.normal(k_res, (B, S, D_out), dtype=jnp.float32)
    weight = jax.random.normal(k_w, (D_out, D_in), dtype=jnp.float32) * 0.02
    bias = jax.random.normal(k_b, (D_out,), dtype=jnp.float32) * 0.02
    gamma = 1.0 + 0.1 * jax.random.normal(k_g, (D_out,), dtype=jnp.float32)
    beta = 0.1 * jax.random.normal(k_be, (D_out,), dtype=jnp.float32)

    # --- f32 test ---
    out = tt_roberta_output(hidden_states, input_tensor, weight, bias,
                            gamma, beta, eps=eps)
    out = jax.block_until_ready(out)
    ref = _reference(hidden_states, input_tensor, weight, bias, gamma, beta, eps)
    assert out.shape == (B, S, D_out)
    assert jnp.allclose(out, ref, atol=1e-4, rtol=1e-4), "f32 mismatch vs reference"

    # --- padding path (B*S not a multiple of the row tile) ---
    Bp, Sp = 3, 5
    hs_p = jax.random.normal(k_x, (Bp, Sp, D_in), dtype=jnp.float32)
    res_p = jax.random.normal(k_res, (Bp, Sp, D_out), dtype=jnp.float32)
    out_p = jax.block_until_ready(
        tt_roberta_output(hs_p, res_p, weight, bias, gamma, beta, eps=eps))
    ref_p = _reference(hs_p, res_p, weight, bias, gamma, beta, eps)
    assert out_p.shape == (Bp, Sp, D_out)
    assert jnp.allclose(out_p, ref_p, atol=1e-4, rtol=1e-4), "padded mismatch"

    # --- bf16 test (native-dtype MXU matmul, f32 accumulation/epilogue) ---
    hs_b = hidden_states.astype(jnp.bfloat16)
    res_b = input_tensor.astype(jnp.bfloat16)
    w_b = weight.astype(jnp.bfloat16)
    out_b = jax.block_until_ready(
        tt_roberta_output(hs_b, res_b, w_b, bias.astype(jnp.bfloat16),
                          gamma.astype(jnp.bfloat16), beta.astype(jnp.bfloat16),
                          eps=eps))
    ref_b = _reference(hs_b, res_b, w_b, bias.astype(jnp.bfloat16),
                       gamma.astype(jnp.bfloat16), beta.astype(jnp.bfloat16), eps)
    assert out_b.dtype == jnp.bfloat16
    assert jnp.allclose(out_b.astype(jnp.float32), ref_b, atol=5e-2, rtol=5e-2), \
        "bf16 mismatch vs reference"

    print("KERNEL_OK")
</pallas_src>

<mosaic_0001>
module attributes {stable_mosaic.version = 11 : i64} {
  func.func @roberta_output_kernel(%arg0: i32, %arg1: memref<16x256xf32, #tpu.memory_space<vmem>>, %arg2: memref<256x128xf32, #tpu.memory_space<vmem>>, %arg3: memref<1x128xf32, #tpu.memory_space<vmem>>, %arg4: memref<16x128xf32, #tpu.memory_space<vmem>>, %arg5: memref<1x128xf32, #tpu.memory_space<vmem>>, %arg6: memref<1x128xf32, #tpu.memory_space<vmem>>, %arg7: memref<16x128xf32, #tpu.memory_space<vmem>>) attributes {dimension_semantics = [#tpu.dimension_semantics<parallel>], iteration_bounds = array<i64: 1>, scalar_prefetch = 0 : i64, scratch_operands = 0 : i64, tpu.core_type = #tpu.core_type<tc>, window_params = [{transform_indices = @transform_0, window_bounds = array<i64: 16, 256>}, {pipeline_mode = #tpu.pipeline_mode<synchronous>, transform_indices = @transform_1, window_bounds = array<i64: 256, 128>}, {pipeline_mode = #tpu.pipeline_mode<synchronous>, transform_indices = @transform_2, window_bounds = array<i64: 1, 128>}, {transform_indices = @transform_3, window_bounds = array<i64: 16, 128>}, {pipeline_mode = #tpu.pipeline_mode<synchronous>, transform_indices = @transform_4, window_bounds = array<i64: 1, 128>}, {pipeline_mode = #tpu.pipeline_mode<synchronous>, transform_indices = @transform_5, window_bounds = array<i64: 1, 128>}, {transform_indices = @transform_6, window_bounds = array<i64: 16, 128>}]} {
    %c0 = arith.constant 0 : index
    %c0_0 = arith.constant 0 : index
    %0 = vector.load %arg1[%c0, %c0_0] : memref<16x256xf32, #tpu.memory_space<vmem>>, vector<16x256xf32>
    %c0_1 = arith.constant 0 : index
    %c0_2 = arith.constant 0 : index
    %1 = vector.load %arg2[%c0_1, %c0_2] : memref<256x128xf32, #tpu.memory_space<vmem>>, vector<256x128xf32>
    %cst = arith.constant dense<0.000000e+00> : vector<16x128xf32>
    %2 = tpu.matmul %0, %1, %cst {dimension_numbers = #tpu.dot_dimension_numbers<[1], [0], [0], [1], [0, 0, 1, 1], [], []>} : vector<16x256xf32>, vector<256x128xf32>, vector<16x128xf32> -> vector<16x128xf32>
    %c0_3 = arith.constant 0 : index
    %c0_4 = arith.constant 0 : index
    %3 = vector.load %arg3[%c0_3, %c0_4] : memref<1x128xf32, #tpu.memory_space<vmem>>, vector<1x128xf32>
    %4 = vector.broadcast %3 : vector<1x128xf32> to vector<16x128xf32>
    %5 = arith.addf %2, %4 : vector<16x128xf32>
    %c0_5 = arith.constant 0 : index
    %c0_6 = arith.constant 0 : index
    %6 = vector.load %arg4[%c0_5, %c0_6] : memref<16x128xf32, #tpu.memory_space<vmem>>, vector<16x128xf32>
    %7 = arith.addf %5, %6 : vector<16x128xf32>
    %cst_7 = arith.constant dense<0.000000e+00> : vector<16xf32>
    %8 = vector.multi_reduction <add>, %7, %cst_7 [1] : vector<16x128xf32> to vector<16xf32>
    %9 = vector.shape_cast %8 : vector<16xf32> to vector<16x1xf32>
    %cst_8 = arith.constant 1.280000e+02 : f32
    %10 = vector.broadcast %cst_8 : f32 to vector<16x1xf32>
    %11 = arith.divf %9, %10 : vector<16x1xf32>
    %12 = vector.broadcast %11 : vector<16x1xf32> to vector<16x128xf32>
    %13 = arith.subf %7, %12 : vector<16x128xf32>
    %14 = arith.mulf %13, %13 : vector<16x128xf32>
    %cst_9 = arith.constant dense<0.000000e+00> : vector<16xf32>
    %15 = vector.multi_reduction <add>, %14, %cst_9 [1] : vector<16x128xf32> to vector<16xf32>
    %16 = vector.shape_cast %15 : vector<16xf32> to vector<16x1xf32>
    %cst_10 = arith.constant 1.280000e+02 : f32
    %17 = vector.broadcast %cst_10 : f32 to vector<16x1xf32>
    %18 = arith.divf %16, %17 : vector<16x1xf32>
    %cst_11 = arith.constant 9.99999996E-13 : f32
    %19 = vector.broadcast %cst_11 : f32 to vector<16x1xf32>
    %20 = arith.addf %18, %19 : vector<16x1xf32>
    %21 = math.rsqrt %20 : vector<16x1xf32>
    %22 = vector.broadcast %21 : vector<16x1xf32> to vector<16x128xf32>
    %23 = arith.mulf %13, %22 : vector<16x128xf32>
    %c0_12 = arith.constant 0 : index
    %c0_13 = arith.constant 0 : index
    %24 = vector.load %arg5[%c0_12, %c0_13] : memref<1x128xf32, #tpu.memory_space<vmem>>, vector<1x128xf32>
    %25 = vector.broadcast %24 : vector<1x128xf32> to vector<16x128xf32>
    %26 = arith.mulf %23, %25 : vector<16x128xf32>
    %c0_14 = arith.constant 0 : index
    %c0_15 = arith.constant 0 : index
    %27 = vector.load %arg6[%c0_14, %c0_15] : memref<1x128xf32, #tpu.memory_space<vmem>>, vector<1x128xf32>
    %28 = vector.broadcast %27 : vector<1x128xf32> to vector<16x128xf32>
    %29 = arith.addf %26, %28 : vector<16x128xf32>
    %c0_16 = arith.constant 0 : index
    %c0_17 = arith.constant 0 : index
    %30 = vector.load %arg7[%c0_16, %c0_17] : memref<16x128xf32, #tpu.memory_space<vmem>>, vector<16x128xf32>
    tpu.vector_store %arg7[%c0_16, %c0_17], %29 {strides = array<i32>} : memref<16x128xf32, #tpu.memory_space<vmem>>, vector<16x128xf32>,
    return
  }
  func.func @transform_0(%arg0: i32) -> (i32, i32) {
    %c0_i32 = arith.constant 0 : i32
    %c0_i32_0 = arith.constant 0 : i32
    return %arg0, %c0_i32 : i32, i32
  }
  func.func @transform_1(%arg0: i32) -> (i32, i32) {
    %c0_i32 = arith.constant 0 : i32
    %c0_i32_0 = arith.constant 0 : i32
    %c0_i32_1 = arith.constant 0 : i32
    return %c0_i32, %c0_i32_0 : i32, i32
  }
  func.func @transform_2(%arg0: i32) -> (i32, i32) {
    %c0_i32 = arith.constant 0 : i32
    %c0_i32_0 = arith.constant 0 : i32
    %c0_i32_1 = arith.constant 0 : i32
    return %c0_i32, %c0_i32_0 : i32, i32
  }
  func.func @transform_3(%arg0: i32) -> (i32, i32) {
    %c0_i32 = arith.constant 0 : i32
    %c0_i32_0 = arith.constant 0 : i32
    return %arg0, %c0_i32 : i32, i32
  }
  func.func @transform_4(%arg0: i32) -> (i32, i32) {
    %c0_i32 = arith.constant 0 : i32
    %c0_i32_0 = arith.constant 0 : i32
    %c0_i32_1 = arith.constant 0 : i32
    return %c0_i32, %c0_i32_0 : i32, i32
  }
  func.func @transform_5(%arg0: i32) -> (i32, i32) {
    %c0_i32 = arith.constant 0 : i32
    %c0_i32_0 = arith.constant 0 : i32
    %c0_i32_1 = arith.constant 0 : i32
    return %c0_i32, %c0_i32_0 : i32, i32
  }
  func.func @transform_6(%arg0: i32) -> (i32, i32) {
    %c0_i32 = arith.constant 0 : i32
    %c0_i32_0 = arith.constant 0 : i32
    return %arg0, %c0_i32 : i32, i32
  }
}

</mosaic_0001>

<bundles_post_ra>
// kernel: tpu_custom_call.1
= control target key start
LH: loop header
LB: loop body
LE: loop exit
PB: predicated region body
PF: predicated region fallthrough
CT: control target
= control target key end

     0   :  { %11 = vsyncpa [#allocation3], 0  ;;  %s492_s0 = inlined_call_operand.hbm [shape: f32[16,256], index: 0, kind: input, shape index: {}]   ;;  %s493_s1 = inlined_call_operand.hbm [shape: f32[256,128], index: 1, kind: input, shape index: {}]   ;;  %s494_s2 = inlined_call_operand.vmem [shape: f32[1,128], index: 2, kind: input, shape index: {}]   ;;  %s495_s3 = inlined_call_operand.hbm [shape: f32[16,128], index: 3, kind: input, shape index: {}]   ;;  %s496_s4 = inlined_call_operand.vmem [shape: f32[1,128], index: 4, kind: input, shape index: {}]   ;;  %s497_s5 = inlined_call_operand.vmem [shape: f32[1,128], index: 5, kind: input, shape index: {}]   ;;  %s498_s6 = inlined_call_operand.hbm [shape: f32[16,128], index: 6, kind: output, shape index: {}]  }
   0x1   :  { %12 = vsyncpa [#allocation6], 0 }
   0x2   :  { %13 = vsyncpa [#allocation4], 0  ;;  %s419_s21 = smov [#allocation5]  }
   0x3   :  { %s31_s22 = sshll.u32 %s419_s21, 4  ;;  %s32_s22 = int_to_ptr.vmem [resolvable:$true] %s31_s22 }
   0x4   :  { %s341_s23 = scalar_lea.vmem %s32_s22, 4096  ;;  %p346_p1 = scmp.lt.s32.totalorder %s32_s22, %s32_s22 }
   0x5   :  { %p342_p0 = scmp.ne.s32.totalorder %s32_s22, %s341_s23  ;;  %p347_p2 = scmp.lt.s32.totalorder %s341_s23, %s341_s23 }
   0x7   :  { %p348_p3 = por %p347_p2, %p346_p1 }
   0x9   :  { %p349_p4 = pnand %p348_p3, %p342_p0 }
   0xb   :  { %352 = shalt.err (!%p349_p4)
}
   0xc   :  { %s420_s24 = smov 128   ;;  %s421_s25 = smov 8  }
   0xd   :  { %37 = dma.hbm_to_vmem [thread:$0]  %s493_s1, 4096, %s32_s22, [#allocation6], %s420_s24, %s420_s24, %s421_s25  }
   0xe   :  { %s422_s28 = smov [#allocation2]  }
   0xf   :  { %s19_s29 = sshll.u32 %s422_s28, 4  ;;  %s20_s29 = int_to_ptr.vmem [resolvable:$true] %s19_s29 }
  0x10   :  { %s361_s30 = scalar_lea.vmem %s20_s29, 512  ;;  %p366_p6 = scmp.lt.s32.totalorder %s20_s29, %s20_s29 }
  0x11   :  { %p362_p5 = scmp.ne.s32.totalorder %s20_s29, %s361_s30  ;;  %p367_p7 = scmp.lt.s32.totalorder %s361_s30, %s361_s30 }
  0x13   :  { %p368_p8 = por %p367_p7, %p366_p6 }
  0x15   :  { %p369_p9 = pnand %p368_p8, %p362_p5 }
  0x17   :  { %372 = shalt.err (!%p369_p9)
}
  0x18   :  { %s423_s7 = smov 256   ;;  %s424_s8 = smov 16  }
  0x19   :  { %25 = dma.hbm_to_vmem [thread:$0]  %s492_s0, 512, %s20_s29, [#allocation3], %s423_s7, %s423_s7, %s424_s8  }
  0x1a   :  { %s425_s11 = smov [#allocation7]  }
  0x1b   :  { %s45_s12 = sshll.u32 %s425_s11, 4  ;;  %s46_s12 = int_to_ptr.vmem [resolvable:$true] %s45_s12 }
  0x1c   :  { %s381_s1 = scalar_lea.vmem %s46_s12, 256  ;;  %p386_p11 = scmp.lt.s32.totalorder %s46_s12, %s46_s12 }
  0x1d   :  { %p382_p10 = scmp.ne.s32.totalorder %s46_s12, %s381_s1  ;;  %p387_p12 = scmp.lt.s32.totalorder %s381_s1, %s381_s1 }
  0x1f   :  { %p388_p13 = por %p387_p12, %p386_p11 }
  0x21   :  { %p389_p0 = pnand %p388_p13, %p382_p10 }
  0x23   :  { %392 = shalt.err (!%p389_p0)
}
  0x24   :  { %51 = dma.hbm_to_vmem [thread:$0]  %s495_s3, 256, %s46_s12, [#allocation6], %s420_s24, %s420_s24, %s421_s25  }
  0x25   :  { %413 = dma.done.wait [#allocation3], 512  }
  0x26   :  { %414 = vsyncadd [#allocation3], 4294966784 }
  0x27   :  { %415 = dma.done.wait [#allocation6], 4352  }
  0x28   :  { %416 = vsyncadd [#allocation6], 4294962944  ;;  %v100_v0 = vld [vmem:[#allocation5 + $0xf8] sm:$0xff]  ;;  %v99_v2 = vld [vmem:[#allocation5 + $0xf0] sm:$0xff]  ;;  %s426_s18 = smov [#allocation8]  }
  0x29   :  { %v84_v1 = vld [vmem:[#allocation5 + $0x78] sm:$0xff]  ;;  %251 = vmatprep.subr.mxu0 %v100_v0  ;;  %289 = vmatprep.subr.mxu1 %v100_v0  ;;  %v83_v3 = vld [vmem:[#allocation5 + $0x70] sm:$0xff]  ;;  %v98_v4 = vld [vmem:[#allocation5 + $0xe8] sm:$0xff]  ;;  %s235_s19 = sshll.u32 %s426_s18, 4  ;;  %s236_s19 = int_to_ptr.vmem [resolvable:$true] %s235_s19 }
  0x2a   :  { %252 = vmatpush3.msra.mxu0 %v84_v1  ;;  %305 = vmatpush3.msra.mxu1 %v84_v1  ;;  %v82_v5 = vld [vmem:[#allocation5 + $0x68] sm:$0xff]  ;;  %v97_v6 = vld [vmem:[#allocation5 + $0xe0] sm:$0xff]  ;;  %v96_v8 = vld [vmem:[#allocation5 + $0xd8] sm:$0xff]  ;;  %s393_s20 = scalar_lea.vmem %s236_s19, 256  ;;  %p398_p2 = scmp.lt.s32.totalorder %s236_s19, %s236_s19 }
  0x2b   :  { %253 = vmatprep.subr.mxu0 %v99_v2  ;;  %290 = vmatprep.subr.mxu1 %v99_v2  ;;  %v81_v7 = vld [vmem:[#allocation5 + $0x60] sm:$0xff]  ;;  %v80_v9 = vld [vmem:[#allocation5 + $0x58] sm:$0xff]  ;;  %v95_v10 = vld [vmem:[#allocation5 + $0xd0] sm:$0xff]  ;;  %p394_p1 = scmp.ne.s32.totalorder %s236_s19, %s393_s20  ;;  %p399_p3 = scmp.lt.s32.totalorder %s393_s20, %s393_s20 }
  0x2c   :  { %254 = vmatpush3.msra.mxu0 %v83_v3  ;;  %306 = vmatpush3.msra.mxu1 %v83_v3  ;;  %v79_v11 = vld [vmem:[#allocation5 + $0x50] sm:$0xff]  ;;  %v94_v12 = vld [vmem:[#allocation5 + $0xc8] sm:$0xff]  ;;  %v93_v14 = vld [vmem:[#allocation5 + $0xc0] sm:$0xff] }
  0x2d   :  { %255 = vmatprep.subr.mxu0 %v98_v4  ;;  %291 = vmatprep.subr.mxu1 %v98_v4  ;;  %v78_v13 = vld [vmem:[#allocation5 + $0x48] sm:$0xff]  ;;  %v77_v15 = vld [vmem:[#allocation5 + $0x40] sm:$0xff]  ;;  %v92_v16 = vld [vmem:[#allocation5 + $0xb8] sm:$0xff]  ;;  %p400_p4 = por %p399_p3, %p398_p2 }
  0x2e   :  { %256 = vmatpush3.msra.mxu0 %v82_v5  ;;  %307 = vmatpush3.msra.mxu1 %v82_v5  ;;  %v76_v17 = vld [vmem:[#allocation5 + $0x38] sm:$0xff]  ;;  %v91_v18 = vld [vmem:[#allocation5 + $0xb0] sm:$0xff]  ;;  %v90_v20 = vld [vmem:[#allocation5 + $0xa8] sm:$0xff] }
  0x2f   :  { %257 = vmatprep.subr.mxu0 %v97_v6  ;;  %292 = vmatprep.subr.mxu1 %v97_v6  ;;  %v75_v19 = vld [vmem:[#allocation5 + $0x30] sm:$0xff]  ;;  %v74_v21 = vld [vmem:[#allocation5 + $0x28] sm:$0xff]  ;;  %v89_v22 = vld [vmem:[#allocation5 + $0xa0] sm:$0xff]  ;;  %p401_p5 = pnand %p400_p4, %p394_p1 }
  0x30   :  { %258 = vmatpush3.msra.mxu0 %v81_v7  ;;  %308 = vmatpush3.msra.mxu1 %v81_v7  ;;  %v73_v23 = vld [vmem:[#allocation5 + $0x20] sm:$0xff]  ;;  %v88_v24 = vld [vmem:[#allocation5 + $0x98] sm:$0xff]  ;;  %v87_v26 = vld [vmem:[#allocation5 + $0x90] sm:$0xff] }
  0x31   :  { %259 = vmatprep.subr.mxu0 %v96_v8  ;;  %293 = vmatprep.subr.mxu1 %v96_v8  ;;  %v72_v25 = vld [vmem:[#allocation5 + $0x18] sm:$0xff]  ;;  %v71_v27 = vld [vmem:[#allocation5 + $0x10] sm:$0xff]  ;;  %v86_v28 = vld [vmem:[#allocation5 + $0x88] sm:$0xff] }
  0x32   :  { %260 = vmatpush3.msra.mxu0 %v80_v9  ;;  %309 = vmatpush3.msra.mxu1 %v80_v9  ;;  %v70_v29 = vld [vmem:[#allocation5 + $0x8] sm:$0xff]  ;;  %v85_v30 = vld [vmem:[#allocation5 + $0x80] sm:$0xff]  ;;  %v68_v34 = vld [vmem:[#allocation2 + $0x18] sm:$0xff] }
  0x33   :  { %261 = vmatprep.subr.mxu0 %v95_v10  ;;  %294 = vmatprep.subr.mxu1 %v95_v10  ;;  %v66_v31 = vld [vmem:[#allocation2 + $0x8] sm:$0xff]  ;;  %v69_v32 = vld [vmem:[#allocation5] sm:$0xff]  ;;  %v67_v35 = vld [vmem:[#allocation2 + $0x10] sm:$0xff] }
  0x34   :  { %262 = vmatpush3.msra.mxu0 %v79_v11  ;;  %310 = vmatpush3.msra.mxu1 %v79_v11  ;;  %v65_v33 = vld [vmem:[#allocation2] sm:$0xff]  ;;  %v184_v47 = vld [vmem:[#allocation7 + $0x8] sm:$0xff] }
  0x35   :  { %263 = vmatprep.subr.mxu0 %v94_v12  ;;  %295 = vmatprep.subr.mxu1 %v94_v12  ;;  %v248_v37 = vld [vmem:[%s494_s2] ss:$0 sm:$0xff] }
  0x36   :  { %264 = vmatpush3.msra.mxu0 %v78_v13  ;;  %311 = vmatpush3.msra.mxu1 %v78_v13  ;;  %v183_v42 = vld [vmem:[#allocation7] sm:$0xff] }
  0x37   :  { %265 = vmatprep.subr.mxu0 %v93_v14  ;;  %296 = vmatprep.subr.mxu1 %v93_v14  ;;  %v249_v0 = vld [vmem:[%s496_s4] ss:$0 sm:$0xff] }
  0x38   :  { %266 = vmatpush3.msra.mxu0 %v77_v15  ;;  %312 = vmatpush3.msra.mxu1 %v77_v15  ;;  %v250_v2 = vld [vmem:[%s497_s5] ss:$0 sm:$0xff] }
  0x39   :  { %267 = vmatprep.subr.mxu0 %v92_v16  ;;  %297 = vmatprep.subr.mxu1 %v92_v16 }
  0x3a   :  { %268 = vmatpush3.msra.mxu0 %v76_v17  ;;  %313 = vmatpush3.msra.mxu1 %v76_v17 }
  0x3b   :  { %269 = vmatprep.subr.mxu0 %v91_v18  ;;  %298 = vmatprep.subr.mxu1 %v91_v18 }
  0x3c   :  { %270 = vmatpush3.msra.mxu0 %v75_v19  ;;  %314 = vmatpush3.msra.mxu1 %v75_v19 }
  0x3d   :  { %271 = vmatprep.subr.mxu0 %v90_v20  ;;  %299 = vmatprep.subr.mxu1 %v90_v20 }
  0x3e   :  { %272 = vmatpush3.msra.mxu0 %v74_v21  ;;  %315 = vmatpush3.msra.mxu1 %v74_v21 }
  0x3f   :  { %273 = vmatprep.subr.mxu0 %v89_v22  ;;  %300 = vmatprep.subr.mxu1 %v89_v22 }
  0x40   :  { %274 = vmatpush3.msra.mxu0 %v73_v23  ;;  %316 = vmatpush3.msra.mxu1 %v73_v23 }
  0x41   :  { %275 = vmatprep.subr.mxu0 %v88_v24  ;;  %301 = vmatprep.subr.mxu1 %v88_v24 }
  0x42   :  { %276 = vmatpush3.msra.mxu0 %v72_v25  ;;  %317 = vmatpush3.msra.mxu1 %v72_v25 }
  0x43   :  { %277 = vmatprep.subr.mxu0 %v87_v26  ;;  %302 = vmatprep.subr.mxu1 %v87_v26 }
  0x44   :  { %278 = vmatpush3.msra.mxu0 %v71_v27  ;;  %318 = vmatpush3.msra.mxu1 %v71_v27 }
  0x45   :  { %279 = vmatprep.subr.mxu0 %v86_v28  ;;  %303 = vmatprep.subr.mxu1 %v86_v28 }
  0x46   :  { %280 = vmatpush3.msra.mxu0 %v70_v29  ;;  %319 = vmatpush3.msra.mxu1 %v70_v29 }
  0x47   :  { %281 = vmatprep.subr.mxu0 %v85_v30  ;;  %172 = vmatprep.mubr.f32.mxu0 %v66_v31 }
  0x48   :  { %282 = vmatpush3.msra.mxu0 %v69_v32  ;;  %304 = vmatprep.subr.mxu1 %v85_v30 }
  0x49   :  { %173 = vmatmul.mubr.f32.vlgmr.msra.gmra.mxu0 %v65_v33  ;;  %320 = vmatpush3.msra.mxu1 %v69_v32 }
  0x4a   :  { %177 = vmatprep.mubr.f32.mxu1 %v68_v34 }
  0x4b   :  { %178 = vmatmul.mubr.f32.vlgmr.msra.gmra.mxu1 %v67_v35 }
 0x109   :  { %v283_v36 = vpop.f32.mrf.mxu0 }
 0x10b   :  { %v284_v38 = vpop.f32.mrf.mxu0  ;;  %v286_v39 = vpop.f32.mrf.mxu1 }
 0x10c   :  { %v285_v40 = vadd.f32 %v284_v38, %v283_v36 }
 0x10d   :  { %v287_v41 = vpop.f32.mrf.mxu1 }
 0x10e   :  { %v175_v43 = vadd.f32 %v285_v40, %v248_v37  ;;  %v288_v44 = vadd.f32 %v287_v41, %v286_v39 }
 0x110   :  { %v180_v45 = vadd.f32 %v288_v44, %v248_v37  ;;  %v185_v46 = vadd.f32 %v183_v42, %v175_v43 }
 0x112   :  { %187 = vadd.xlane.f32.xlu0 %v185_v46  ;;  %v186_v48 = vadd.f32 %v184_v47, %v180_v45 }
 0x116   :  { %189 = vadd.xlane.f32.xlu0 %v186_v48 }
 0x19b   :  { %v188_v49 = vpop.xlane.xlu0 %187 }
 0x19c   :  { %v192_v50 = vmul.f32 0.0078125, %v188_v49 }
 0x19e   :  { %v194_v51 = vsub.f32 %v185_v46, %v192_v50 }
 0x19f   :  { %v190_v52 = vpop.xlane.xlu0 %189 }
 0x1a0   :  { %v193_v53 = vmul.f32 0.0078125, %v190_v52  ;;  %v196_v54 = vmul.f32 %v194_v51, %v194_v51 }
 0x1a2   :  { %v195_v55 = vsub.f32 %v186_v48, %v193_v53  ;;  %198 = vadd.xlane.f32.xlu1 %v196_v54 }
 0x1a4   :  { %v197_v56 = vmul.f32 %v195_v55, %v195_v55 }
 0x1a6   :  { %200 = vadd.xlane.f32.xlu1 %v197_v56 }
 0x22b   :  { %v199_v57 = vpop.xlane.xlu1 %198 }
 0x22c   :  { %v202_v58 = vmul.f32 0.0078125, %v199_v57 }
 0x22e   :  { %v204_v59 = vadd.f32 1e-12, %v202_v58 }
 0x22f   :  { %v201_v60 = vpop.xlane.xlu1 %200 }
 0x230   :  { %329 = vrsqrt.f32 %v204_v59  ;;  %v203_v61 = vmul.f32 0.0078125, %v201_v60 }
 0x232   :  { %v205_v62 = vadd.f32 1e-12, %v203_v61 }
 0x234   :  { %331 = vrsqrt.f32 %v205_v62 }
 0x23d   :  { %v330_v63 = vpop.eup %329 }
 0x23e   :  { %v208_v1 = vmul.f32 %v330_v63, %v194_v51 }
 0x240   :  { %v217_v3 = vmul.f32 %v249_v0, %v208_v1 }
 0x241   :  { %v332_v4 = vpop.eup %331 }
 0x242   :  { %v209_v5 = vmul.f32 %v332_v4, %v195_v55  ;;  %v226_v6 = vadd.f32 %v250_v2, %v217_v3 }
 0x244   :  { %v218_v7 = vmul.f32 %v249_v0, %v209_v5  ;;  %228 = vst [vmem:[#allocation8] sm:$0xff] %v226_v6 }
 0x246   :  { %v227_v8 = vadd.f32 %v250_v2, %v218_v7 }
 0x248   :  { %229 = vst [vmem:[#allocation8 + $0x8] sm:$0xff] %v227_v8 }
 0x249   :  { %404 = shalt.err (!%p401_p5)
}
 0x24a   :  { %241 = dma.vmem_to_hbm [thread:$0]  %s236_s19, 256, %s498_s6, [#allocation4], %s420_s24, %s420_s24, %s421_s25  }
 0x24b   :  { %417 = dma.done.wait [#allocation4], 256  }
 0x24c   :  { %418 = vsyncadd [#allocation4], 4294967040 }
 0x24d   :  { %245 = vsyncpa [#allocation3], 1 }
 0x24e   :  { %246 = vsyncpa [#allocation6], 1 }
 0x24f   :  { %247 = vsyncpa [#allocation4], 1 }

</bundles_post_ra>
